<compile_context>
chip_gen: v5e
topology: v5e:2x2
jax: 0.10.0
libtpu: 0.0.40
codegen_flags: <defaults>
</compile_context>

<pallas_src>
import jax
import jax.numpy as jnp
from jax.experimental import pallas as pl
from jax.experimental.pallas import tpu as pltpu

MIN_VALUE = -0.5
MAX_VALUE = 0.5


def linear_clamp_kernel(x_ref, w_ref, b_ref, o_ref):
    # x_ref: (B, K), w_ref: (K, N), b_ref: (1, N), o_ref: (B, N). All f32.
    y = jnp.dot(x_ref[...], w_ref[...], preferred_element_type=jnp.float32)
    y = y + b_ref[...]
    y = jnp.maximum(y, MIN_VALUE)   # clamp_min
    y = jnp.minimum(y, MAX_VALUE)   # clamp_max
    o_ref[...] = y.astype(o_ref.dtype)


def prepare_params(w, b):
    """One-time layout prep: PyTorch Linear stores w as (N, K); kernel wants (K, N).

    Done once at init so no transpose/reshape kernels are dispatched per call.
    """
    return jnp.asarray(w).T, jnp.asarray(b).reshape(1, -1)


def linear_clamp(x, w_t, b2):
    """x: (B, K) f32, w_t: (K, N) f32 (pre-transposed), b2: (1, N) f32 -> (B, N)."""
    B = x.shape[0]
    N = w_t.shape[1]
    return pl.pallas_call(
        linear_clamp_kernel,
        out_shape=jax.ShapeDtypeStruct((B, N), jnp.float32),
        in_specs=[
            pl.BlockSpec(memory_space=pltpu.MemorySpace.VMEM),
            pl.BlockSpec(memory_space=pltpu.MemorySpace.VMEM),
            pl.BlockSpec(memory_space=pltpu.MemorySpace.VMEM),
        ],
        out_specs=pl.BlockSpec(memory_space=pltpu.MemorySpace.VMEM),
    )(x, w_t, b2)


def reference(x, w, b):
    y = x @ w.T + b
    return jnp.minimum(jnp.maximum(y, MIN_VALUE), MAX_VALUE)


if __name__ == "__main__":
    key = jax.random.PRNGKey(0)
    kx, kw, kb = jax.random.split(key, 3)

    # Module: Linear(8, 16). Spec input is (1, 8); we batch 8 rows per call so
    # the batch fills the sublane axis and the per-call floor is amortized.
    in_features, out_features = 8, 16
    batch = 8

    x = jax.random.normal(kx, (batch, in_features), dtype=jnp.float32)
    bound = 1.0 / jnp.sqrt(in_features)
    w = jax.random.uniform(kw, (out_features, in_features),
                           minval=-bound, maxval=bound, dtype=jnp.float32)
    b = jax.random.uniform(kb, (out_features,),
                           minval=-bound, maxval=bound, dtype=jnp.float32)

    # One-time parameter layout prep (not per call).
    w_t, b2 = prepare_params(w, b)

    out = jax.block_until_ready(linear_clamp(x, w_t, b2))
    ref = reference(x, w, b)

    assert out.shape == (batch, out_features)
    assert jnp.allclose(out, ref, atol=1e-5, rtol=1e-5)

    # Also check the spec's exact shape (batch=1) for semantics parity.
    out1 = jax.block_until_ready(linear_clamp(x[:1], w_t, b2))
    assert out1.shape == (1, out_features)
    assert jnp.allclose(out1, ref[:1], atol=1e-5, rtol=1e-5)

    print("KERNEL_OK")
</pallas_src>

<mosaic_0001>
module attributes {stable_mosaic.version = 11 : i64} {
  func.func @linear_clamp_kernel(%arg0: memref<8x8xf32, #tpu.memory_space<vmem>>, %arg1: memref<8x16xf32, #tpu.memory_space<vmem>>, %arg2: memref<1x16xf32, #tpu.memory_space<vmem>>, %arg3: memref<8x16xf32, #tpu.memory_space<vmem>>) attributes {dimension_semantics = [], scalar_prefetch = 0 : i64, scratch_operands = 0 : i64, tpu.core_type = #tpu.core_type<tc>} {
    %c0 = arith.constant 0 : index
    %c0_0 = arith.constant 0 : index
    %0 = vector.load %arg0[%c0, %c0_0] : memref<8x8xf32, #tpu.memory_space<vmem>>, vector<8x8xf32>
    %c0_1 = arith.constant 0 : index
    %c0_2 = arith.constant 0 : index
    %1 = vector.load %arg1[%c0_1, %c0_2] : memref<8x16xf32, #tpu.memory_space<vmem>>, vector<8x16xf32>
    %cst = arith.constant dense<0.000000e+00> : vector<8x16xf32>
    %2 = tpu.matmul %0, %1, %cst {dimension_numbers = #tpu.dot_dimension_numbers<[1], [0], [0], [1], [0, 0, 1, 1], [], []>} : vector<8x8xf32>, vector<8x16xf32>, vector<8x16xf32> -> vector<8x16xf32>
    %c0_3 = arith.constant 0 : index
    %c0_4 = arith.constant 0 : index
    %3 = vector.load %arg2[%c0_3, %c0_4] : memref<1x16xf32, #tpu.memory_space<vmem>>, vector<1x16xf32>
    %4 = vector.broadcast %3 : vector<1x16xf32> to vector<8x16xf32>
    %5 = arith.addf %2, %4 : vector<8x16xf32>
    %cst_5 = arith.constant -5.000000e-01 : f32
    %6 = vector.broadcast %cst_5 : f32 to vector<8x16xf32>
    %7 = arith.maximumf %5, %6 : vector<8x16xf32>
    %cst_6 = arith.constant 5.000000e-01 : f32
    %8 = vector.broadcast %cst_6 : f32 to vector<8x16xf32>
    %9 = arith.minimumf %7, %8 : vector<8x16xf32>
    %c0_7 = arith.constant 0 : index
    %c0_8 = arith.constant 0 : index
    %10 = vector.load %arg3[%c0_7, %c0_8] : memref<8x16xf32, #tpu.memory_space<vmem>>, vector<8x16xf32>
    tpu.vector_store %arg3[%c0_7, %c0_8], %9 {strides = array<i32>} : memref<8x16xf32, #tpu.memory_space<vmem>>, vector<8x16xf32>,
    return
  }
}

</mosaic_0001>

<bundles_post_ra>
// kernel: tpu_custom_call.1
= control target key start
LH: loop header
LB: loop body
LE: loop exit
PB: predicated region body
PF: predicated region fallthrough
CT: control target
= control target key end

     0   :  { %8 = vsyncpa [#allocation3], 0  ;;  %s214_s0 = inlined_call_operand.hbm [shape: f32[8,8], index: 0, kind: input, shape index: {}]   ;;  %s215_s1 = inlined_call_operand.hbm [shape: f32[8,16], index: 1, kind: input, shape index: {}]   ;;  %s216_s2 = inlined_call_operand.vmem [shape: f32[1,16], index: 2, kind: input, shape index: {}]   ;;  %s217_s3 = inlined_call_operand.hbm [shape: f32[8,16], index: 3, kind: output, shape index: {}]  }
   0x1   :  { %9 = vsyncpa [#allocation6], 0 }
   0x2   :  { %10 = vsyncpa [#allocation4], 0  ;;  %s16_s14 = sshll.u32 %s214_s0, 4  ;;  %s179_s15 = smov [#allocation2]   ;;  %s17_s14 = int_to_ptr.hbm [resolvable:$true] %s16_s14 }
   0x3   :  { %s18_s16 = sshll.u32 %s179_s15, 4  ;;  %s27_s19 = sshll.u32 %s215_s1, 4  ;;  %s19_s16 = int_to_ptr.vmem [resolvable:$true] %s18_s16  ;;  %s28_s19 = int_to_ptr.hbm [resolvable:$true] %s27_s19 }
   0x4   :  { %21 = dma.hbm_to_vmem [thread:$0]  %s17_s14, 128, %s19_s16, [#allocation3]  }
   0x5   :  { %s180_s20 = smov [#allocation5]  }
   0x6   :  { %s29_s21 = sshll.u32 %s180_s20, 4  ;;  %s30_s21 = int_to_ptr.vmem [resolvable:$true] %s29_s21 }
   0x7   :  { %32 = dma.hbm_to_vmem [thread:$0]  %s28_s19, 128, %s30_s21, [#allocation6]  }
   0x8   :  { %173 = dma.done.wait [#allocation3], 128  }
   0x9   :  { %174 = vsyncadd [#allocation3], 4294967168 }
   0xa   :  { %175 = dma.done.wait [#allocation6], 128  }
   0xb   :  { %176 = vsyncadd [#allocation6], 4294967168  ;;  %vm49_vm0 = vcmask 64512   ;;  %v44_v0 = vld [vmem:[#allocation5] sm:$0xff]  ;;  %v43_v1 = vld [vmem:[#allocation2] sm:$0xff]  ;;  %s181_s1 = smov [#allocation7]  }
   0xc   :  { %68 = vmatpush.msra.mxu0 %v44_v0  ;;  %v100_v2 = vld [vmem:[%s216_s2] ss:$0 sm:$0xff]  ;;  %s82_s23 = sshll.u32 %s181_s1, 4  ;;  %s84_s26 = sshll.u32 %s217_s3, 4  ;;  %vm75_vm1 = vcmask 130048   ;;  %s83_s23 = int_to_ptr.vmem [resolvable:$true] %s82_s23  ;;  %s85_s26 = int_to_ptr.hbm [resolvable:$true] %s84_s26 }
   0xd   :  { %95 = vmatmul.msk.f32.vlgmr.msra.gmra.mxu0 %vm49_vm0, %v43_v1 }
  0x8a   :  { %v70_v3 = vpop.f32.mrf.mxu0 }
  0x8b   :  { %v71_v4 = vadd.f32 %v100_v2, %v70_v3 }
  0x8d   :  { %v96_v5 = vclamps-f32 %v71_v4, 0.5 }
  0x8f   :  { %76 = vst.msk [vmem:[#allocation7] sm:$0xff] %vm75_vm1, %v96_v5 }
  0x90   :  { %87 = dma.vmem_to_hbm [thread:$0]  %s83_s23, 128, %s85_s26, [#allocation4]  }
  0x91   :  { %177 = dma.done.wait [#allocation4], 128  }
  0x92   :  { %178 = vsyncadd [#allocation4], 4294967168 }
  0x93   :  { %92 = vsyncpa [#allocation3], 1 }
  0x94   :  { %93 = vsyncpa [#allocation6], 1 }
  0x95   :  { %94 = vsyncpa [#allocation4], 1 }

</bundles_post_ra>
